<compile_context>
chip_gen: v6e
topology: v6e:2x2x1
jax: 0.10.0
libtpu: 0.0.40
codegen_flags: <defaults>
</compile_context>

<pallas_src>
import jax
import jax.numpy as jnp
from jax import lax
from jax.experimental import pallas as pl
from jax.experimental.pallas import tpu as pltpu


# ---------------------------------------------------------------------------
# Kernels
# ---------------------------------------------------------------------------
def _fused_kernel(node_ref, edge_ref, out_ref):
    # node_ref: (N_nodes, D) f32, edge_ref: (N_edges, D) f32 -- both fully
    # resident in VMEM; out_ref: (N_nodes, N_edges) f32.
    de = jnp.tanh(2.0 * node_ref[...])
    ee = jnp.tanh(2.0 * edge_ref[...])
    # Contract the last dim of both operands: feeds the MXU directly, no
    # materialized ee.T / XLU transpose.
    adj = lax.dot_general(
        de, ee,
        dimension_numbers=(((1,), (1,)), ((), ())),
        preferred_element_type=jnp.float32,
    )
    # relu(tanh(2x)) == tanh(2*relu(x)) (tanh odd & monotone): VPU max first,
    # single EUP tanh after.
    out_ref[...] = jnp.tanh(2.0 * jnp.maximum(adj, 0.0))


def _tiled_kernel(node_ref, edge_ref, out_ref, acc_ref):
    # Tiled path for production-scale shapes: grid = (M/tm, N/tn, K/tk),
    # K is the innermost ("arbitrary") reduction axis with an f32 accumulator.
    k = pl.program_id(2)

    @pl.when(k == 0)
    def _():
        acc_ref[...] = jnp.zeros_like(acc_ref)

    de = jnp.tanh(2.0 * node_ref[...])
    ee = jnp.tanh(2.0 * edge_ref[...])
    acc_ref[...] += lax.dot_general(
        de, ee,
        dimension_numbers=(((1,), (1,)), ((), ())),
        preferred_element_type=jnp.float32,
    )

    @pl.when(k == pl.num_programs(2) - 1)
    def _():
        out_ref[...] = jnp.tanh(2.0 * jnp.maximum(acc_ref[...], 0.0))


# ---------------------------------------------------------------------------
# Wrapper
# ---------------------------------------------------------------------------
def adp_hygraph_generation(node_attr: jax.Array, edge_attr: jax.Array) -> jax.Array:
    """Pallas TPU implementation of adp_hygraph_generation.forward()."""
    n_nodes, d = node_attr.shape
    n_edges, d_e = edge_attr.shape
    assert d == d_e, "node/edge embedding dims must match"

    cost = pl.CostEstimate(
        flops=2 * n_nodes * n_edges * d,
        transcendentals=n_nodes * d + n_edges * d + n_nodes * n_edges,
        bytes_accessed=4 * (n_nodes * d + n_edges * d + n_nodes * n_edges),
    )

    # Decide between the single-block fused kernel (small shapes) and the
    # tiled kernel (large shapes, 128-granular dims).
    single_block_bytes = 4 * (n_nodes * d + n_edges * d + n_nodes * n_edges)

    def _pick_tile(dim):
        for t in (512, 256, 128):
            if dim % t == 0:
                return t
        return None

    tm, tn, tk = _pick_tile(n_nodes), _pick_tile(n_edges), _pick_tile(d)
    use_tiled = single_block_bytes > (8 << 20) and None not in (tm, tn, tk)

    if not use_tiled:
        # Small / non-tileable case: one program, no grid machinery, all three
        # operands live in VMEM as single full-array blocks.
        return pl.pallas_call(
            _fused_kernel,
            out_shape=jax.ShapeDtypeStruct((n_nodes, n_edges), jnp.float32),
            in_specs=[
                pl.BlockSpec(memory_space=pltpu.MemorySpace.VMEM),
                pl.BlockSpec(memory_space=pltpu.MemorySpace.VMEM),
            ],
            out_specs=pl.BlockSpec(memory_space=pltpu.MemorySpace.VMEM),
            cost_estimate=cost,
        )(node_attr, edge_attr)

    # Production-scale path: 2-D output tiling + K reduction. M/N tiles are
    # "parallel" (shards across the 2 TensorCores on v7x); tile sizes are
    # 128/256/512-granular so output stores stay lane-dense.
    grid = (n_nodes // tm, n_edges // tn, d // tk)
    return pl.pallas_call(
        _tiled_kernel,
        out_shape=jax.ShapeDtypeStruct((n_nodes, n_edges), jnp.float32),
        grid_spec=pltpu.PrefetchScalarGridSpec(
            num_scalar_prefetch=0,
            grid=grid,
            in_specs=[
                pl.BlockSpec((tm, tk), lambda i, j, k: (i, k)),
                pl.BlockSpec((tn, tk), lambda i, j, k: (j, k)),
            ],
            out_specs=pl.BlockSpec((tm, tn), lambda i, j, k: (i, j)),
            scratch_shapes=[pltpu.VMEM((tm, tn), jnp.float32)],
        ),
        compiler_params=pltpu.CompilerParams(
            dimension_semantics=("parallel", "parallel", "arbitrary"),
        ),
        cost_estimate=cost,
    )(node_attr, edge_attr)


# ---------------------------------------------------------------------------
# Reference & test
# ---------------------------------------------------------------------------
def _reference(node_attr, edge_attr):
    de = jnp.tanh(2.0 * node_attr)
    ee = jnp.tanh(2.0 * edge_attr).T
    return jax.nn.relu(jnp.tanh(2.0 * (de @ ee)))


if __name__ == "__main__":
    # Module hyperparameters (small, consistent with __init__ signature).
    N_nodes, N_edges, embed_dim = 16, 8, 32

    # Deterministic parameter init mirroring torch.rand (uniform in [0, 1)).
    key = jax.random.PRNGKey(0)
    k_node, k_edge = jax.random.split(key)
    node_attr = jax.random.uniform(k_node, (N_nodes, embed_dim), dtype=jnp.float32)
    edge_attr = jax.random.uniform(k_edge, (N_edges, embed_dim), dtype=jnp.float32)

    adj = adp_hygraph_generation(node_attr, edge_attr)
    adj = jax.block_until_ready(adj)

    # Sanity check against a pure-JAX reference.
    ref = _reference(node_attr, edge_attr)
    assert adj.shape == (N_nodes, N_edges)
    assert jnp.allclose(adj, ref, atol=1e-5, rtol=1e-5), "mismatch vs reference"

    print("KERNEL_OK")
</pallas_src>

<mosaic_0001>
module attributes {stable_mosaic.version = 11 : i64} {
  func.func @_fused_kernel(%arg0: memref<16x32xf32, #tpu.memory_space<vmem>>, %arg1: memref<8x32xf32, #tpu.memory_space<vmem>>, %arg2: memref<16x8xf32, #tpu.memory_space<vmem>>) attributes {dimension_semantics = [], scalar_prefetch = 0 : i64, scratch_operands = 0 : i64, tpu.core_type = #tpu.core_type<tc>} {
    %c0 = arith.constant 0 : index
    %c0_0 = arith.constant 0 : index
    %0 = vector.load %arg0[%c0, %c0_0] : memref<16x32xf32, #tpu.memory_space<vmem>>, vector<16x32xf32>
    %cst = arith.constant 2.000000e+00 : f32
    %1 = vector.broadcast %cst : f32 to vector<16x32xf32>
    %2 = arith.mulf %1, %0 : vector<16x32xf32>
    %3 = math.tanh %2 : vector<16x32xf32>
    %c0_1 = arith.constant 0 : index
    %c0_2 = arith.constant 0 : index
    %4 = vector.load %arg1[%c0_1, %c0_2] : memref<8x32xf32, #tpu.memory_space<vmem>>, vector<8x32xf32>
    %cst_3 = arith.constant 2.000000e+00 : f32
    %5 = vector.broadcast %cst_3 : f32 to vector<8x32xf32>
    %6 = arith.mulf %5, %4 : vector<8x32xf32>
    %7 = math.tanh %6 : vector<8x32xf32>
    %cst_4 = arith.constant dense<0.000000e+00> : vector<16x8xf32>
    %8 = tpu.matmul %3, %7, %cst_4 {dimension_numbers = #tpu.dot_dimension_numbers<[1], [1], [0], [0], [0, 0, 1, 0], [], []>} : vector<16x32xf32>, vector<8x32xf32>, vector<16x8xf32> -> vector<16x8xf32>
    %cst_5 = arith.constant 0.000000e+00 : f32
    %9 = vector.broadcast %cst_5 : f32 to vector<16x8xf32>
    %10 = arith.maximumf %8, %9 : vector<16x8xf32>
    %cst_6 = arith.constant 2.000000e+00 : f32
    %11 = vector.broadcast %cst_6 : f32 to vector<16x8xf32>
    %12 = arith.mulf %11, %10 : vector<16x8xf32>
    %13 = math.tanh %12 : vector<16x8xf32>
    %c0_7 = arith.constant 0 : index
    %c0_8 = arith.constant 0 : index
    %14 = vector.load %arg2[%c0_7, %c0_8] : memref<16x8xf32, #tpu.memory_space<vmem>>, vector<16x8xf32>
    tpu.vector_store %arg2[%c0_7, %c0_8], %13 {strides = array<i32>} : memref<16x8xf32, #tpu.memory_space<vmem>>, vector<16x8xf32>,
    return
  }
}

</mosaic_0001>

<bundles_post_ra>
// kernel: tpu_custom_call.1
= control target key start
LH: loop header
LB: loop body
LE: loop exit
PB: predicated region body
PF: predicated region fallthrough
CT: control target
= control target key end

     0   :  { %7 = vsyncpa [#allocation3], 0  ;;  %s246_s0 = inlined_call_operand.hbm [shape: f32[16,32], index: 0, kind: input, shape index: {}]   ;;  %s247_s1 = inlined_call_operand.hbm [shape: f32[8,32], index: 1, kind: input, shape index: {}]   ;;  %s248_s2 = inlined_call_operand.vmem [shape: f32[16,8], index: 2, kind: output, shape index: {}]  }
   0x1   :  { %8 = vsyncpa [#allocation5], 0  ;;  %s215_s9 = smov [#allocation2]  }
   0x2   :  { %s14_s10 = sshll.u32 %s215_s9, 4  ;;  %s15_s10 = int_to_ptr.vmem [resolvable:$true] %s14_s10 }
   0x3   :  { %s179_s11 = scalar_lea.vmem %s15_s10, 256  ;;  %p184_p1 = scmp.lt.s32.totalorder %s15_s10, %s15_s10 }
   0x4   :  { %p180_p0 = scmp.ne.s32.totalorder %s15_s10, %s179_s11  ;;  %p185_p2 = scmp.lt.s32.totalorder %s179_s11, %s179_s11 }
   0x6   :  { %p186_p3 = por %p185_p2, %p184_p1 }
   0x8   :  { %p187_p4 = pnand %p186_p3, %p180_p0 }
   0xa   :  { %190 = shalt.err (!%p187_p4)
}
   0xb   :  { %s216_s12 = smov 128   ;;  %s217_s13 = smov 8  }
   0xc   :  { %20 = dma.hbm_to_vmem [thread:$0]  %s246_s0, 256, %s15_s10, [#allocation3], %s216_s12, %s216_s12, %s217_s13  }
   0xd   :  { %s218_s16 = smov [#allocation4]  }
   0xe   :  { %s27_s17 = sshll.u32 %s218_s16, 4  ;;  %s28_s17 = int_to_ptr.vmem [resolvable:$true] %s27_s17 }
   0xf   :  { %s199_s18 = scalar_lea.vmem %s28_s17, 128  ;;  %p204_p6 = scmp.lt.s32.totalorder %s28_s17, %s28_s17 }
  0x10   :  { %p200_p5 = scmp.ne.s32.totalorder %s28_s17, %s199_s18  ;;  %p205_p7 = scmp.lt.s32.totalorder %s199_s18, %s199_s18 }
  0x12   :  { %p206_p8 = por %p205_p7, %p204_p6 }
  0x14   :  { %p207_p9 = pnand %p206_p8, %p200_p5 }
  0x16   :  { %210 = shalt.err (!%p207_p9)
}
  0x17   :  { %30 = dma.hbm_to_vmem [thread:$0]  %s247_s1, 128, %s28_s17, [#allocation5]  }
  0x18   :  { %211 = dma.done.wait [#allocation3], 256  }
  0x19   :  { %212 = vsyncadd [#allocation3], 4294967040 }
  0x1a   :  { %213 = dma.done.wait [#allocation5], 128  }
  0x1b   :  { %214 = vsyncadd [#allocation5], 4294967168  ;;  %v38_v0 = vld [vmem:[#allocation2 + $0x8] sm:$0xff]  ;;  %v43_v1 = vld [vmem:[#allocation4] sm:$0xff]  ;;  %vm46_vm0 = vcmask 261120   ;;  %vm137_vm1 = vcmask 64512  }
  0x1c   :  { %v37_v2 = vld [vmem:[#allocation2] sm:$0xff]  ;;  %v44_v3 = vmul.f32 2.0, %v43_v1  ;;  %v40_v5 = vmul.f32 2.0, %v38_v0 }
  0x1d   :  { %v39_v4 = vmul.f32 2.0, %v37_v2 }
  0x1e   :  { %161 = vtanh.f32 %v44_v3 }
  0x1f   :  { %163 = vtanh.f32 %v39_v4 }
  0x20   :  { %165 = vtanh.f32 %v40_v5 }
  0x2b   :  { %v162_v6 = vpop.eup %161 }
  0x2c   :  { %v164_v7 = vpop.eup %163  ;;  %152 = vmatprep.subr.msk.mxu0 %vm46_vm0, %v162_v6 }
  0x2d   :  { %v166_v8 = vpop.eup %165  ;;  %153 = vmatpush3.xpose.msk.msra.mxu0 %vm46_vm0, %v162_v6  ;;  %154 = vmatprep.mubr.msk.f32.mxu0 %vm46_vm0, %v164_v7 }
  0x30   :  { %155 = vmatmul.mubr.msk.f32.vlgmr.msra.gmra.mxu0 %vm46_vm0, %v166_v8 }
  0xf0   :  { %v156_v9 = vpop.f32.mrf.mxu0 }
  0xf1   :  { %v132_v10 = vmax.f32 %v156_v9, 0.0 }
  0xf2   :  { %v122_v11 = vpop.f32.mrf.mxu0 }
  0xf3   :  { %v134_v12 = vmul.f32 2.0, %v132_v10  ;;  %v131_v13 = vmax.f32 %v122_v11, 0.0 }
  0xf5   :  { %167 = vtanh.f32 %v134_v12  ;;  %v133_v14 = vmul.f32 2.0, %v131_v13 }
  0xf7   :  { %169 = vtanh.f32 %v133_v14 }
 0x102   :  { %v168_v15 = vpop.eup %167 }
 0x103   :  { %139 = vst.msk [vmem:[%s248_s2 + $0x8] sm:$0xff] %vm137_vm1, %v168_v15 }
 0x104   :  { %v170_v16 = vpop.eup %169 }
 0x105   :  { %138 = vst.msk [vmem:[%s248_s2] sm:$0xff] %vm137_vm1, %v170_v16 }
 0x106   :  { %144 = vsyncpa [#allocation3], 1 }
 0x107   :  { %145 = vsyncpa [#allocation5], 1 }

</bundles_post_ra>
